<compile_context>
chip_gen: v7x
topology: tpu7x:2x2x1
jax: 0.10.0
libtpu: 0.0.40
codegen_flags: <defaults>
</compile_context>

<pallas_src>
import jax
import jax.numpy as jnp
from jax.experimental import pallas as pl
from jax.experimental.pallas import tpu as pltpu

classes = ['', 'aeroplane', 'bicycle', 'bird', 'boat', 'bottle', 'bus', 'car',
           'cat', 'chair', 'cow', 'diningtable', 'dog', 'horse', 'motorbike',
           'person', 'pottedplant', 'sheep', 'sofa', 'train', 'tvmonitor']

target_classes = ['', 'person', 'bicycle', 'motorbike', 'bus', 'car']
TARGET_INDEX = [classes.index(name) for name in target_classes]   # [0, 15, 2, 14, 6, 7]

LANE = 128       # TPU lane width
SUB = 8          # sublane count


def _filter_kernel(labels_ref, newlab_ref):
    """Membership test + class-id remap.

    labels_ref : VMEM (rt, 128) int32  -- padded label ids (-1 = padding)
    newlab_ref : VMEM (rt, 128) int32  -- index_map[label] if kept else -1
    """
    labels = labels_ref[...]
    newlab = jnp.full(labels.shape, -1, dtype=jnp.int32)
    # K=6 static unroll against compile-time constants: pure int32 VPU
    # compares/selects, no SMEM reads, no MXU/XLU.  TARGET_INDEX values are
    # distinct so the where-chain cannot double-assign.
    for k, cls_id in enumerate(TARGET_INDEX):
        newlab = jnp.where(labels == cls_id, jnp.int32(k), newlab)
    newlab_ref[...] = newlab


def filter_categories(image, target):
    """JAX equivalent of FilterCategories.forward (padded, static-shape output)."""
    boxes = target['boxes']                       # (N, 4) float32
    labels = target['labels'].astype(jnp.int32)   # (N,)   int
    N = labels.shape[0]

    # ---- lane-dense padding: pad to a multiple of 128 with -1 (never kept) ----
    n_pad = max(LANE, ((N + LANE - 1) // LANE) * LANE)
    rows = n_pad // LANE
    labels_p = jnp.full((n_pad,), -1, dtype=jnp.int32).at[:N].set(labels)
    labels_2d = labels_p.reshape(rows, LANE)

    # Row tiling: 8-row (full-vreg) tiles when possible, otherwise one block.
    row_tile = SUB if rows % SUB == 0 else rows
    grid = (rows // row_tile,)

    newlab_2d = pl.pallas_call(
        _filter_kernel,
        out_shape=jax.ShapeDtypeStruct((rows, LANE), jnp.int32),
        grid=grid,
        in_specs=[pl.BlockSpec((row_tile, LANE), lambda i: (i, 0))],
        out_specs=pl.BlockSpec((row_tile, LANE), lambda i: (i, 0)),
        compiler_params=pltpu.CompilerParams(
            dimension_semantics=("parallel",)),   # shards across TCs on v7x
    )(labels_2d)

    newlab = newlab_2d.reshape(-1)[:N]            # (N,)
    mask = newlab >= 0                            # (N,)

    # ---- O(N) cumsum + scatter compaction (replaces argsort) ----
    # torch's boxes[mask] / labels[mask] need a dynamic output shape; emulate
    # with a stable front-compaction into padded buffers + num_valid count.
    # TODO(synk): true dynamic-shape filtering has no Pallas/TPU equivalent.
    keep_count = jnp.cumsum(mask.astype(jnp.int32))
    num_valid = keep_count[-1]
    dest = jnp.where(mask, keep_count - 1, N)     # filtered rows -> sink row N

    boxes_out = jnp.zeros((N + 1, 4), boxes.dtype).at[dest].set(boxes)[:N]
    # torch returns int64 labels; JAX default (x64 disabled) keeps int32.
    labels_out = jnp.full((N + 1,), -1, dtype=jnp.int32).at[dest].set(newlab)[:N]

    new_target = {
        'boxes': boxes_out,          # (N, 4) padded with zeros past num_valid
        'labels': labels_out,        # (N,)   padded with -1 past num_valid
        'num_valid': num_valid,      # scalar count of kept detections
        'mask': mask,                # per-input-row keep mask
    }
    return image, new_target


if __name__ == "__main__":
    key = jax.random.PRNGKey(0)
    k_img, k_lab, k_box = jax.random.split(key, 3)

    B, C, H, W = 2, 4, 16, 16          # image: NCHW, passthrough
    N = 8                              # number of detections / labels

    image = jax.random.normal(k_img, (B, C, H, W), dtype=jnp.float32)
    labels = jax.random.randint(k_lab, (N,), 0, len(classes), dtype=jnp.int32)
    boxes = jax.random.uniform(k_box, (N, 4), dtype=jnp.float32)

    out_image, out_target = jax.jit(filter_categories)(image, {'boxes': boxes,
                                                               'labels': labels})
    jax.block_until_ready(out_target['boxes'])

    # Cross-check against a plain-Python reference of the torch semantics.
    index_map = {idx: i for i, idx in enumerate(TARGET_INDEX)}
    lab_host = [int(v) for v in labels]
    ref_mask = [l in TARGET_INDEX for l in lab_host]
    ref_labels = [index_map[l] for l, m in zip(lab_host, ref_mask) if m]
    ref_boxes = boxes[jnp.asarray(ref_mask, dtype=bool)]

    nv = int(out_target['num_valid'])
    assert nv == len(ref_labels)
    assert [int(v) for v in out_target['labels'][:nv]] == ref_labels
    assert jnp.allclose(out_target['boxes'][:nv], ref_boxes)
    assert [bool(v) for v in out_target['mask']] == ref_mask
    assert bool(jnp.all(out_image == image))

    print("KERNEL_OK")
</pallas_src>

<mosaic_0001>
module attributes {stable_mosaic.version = 11 : i64} {
  func.func @_filter_kernel(%arg0: i32, %arg1: memref<1x128xi32, #tpu.memory_space<vmem>>, %arg2: memref<1x128xi32, #tpu.memory_space<vmem>>) attributes {dimension_semantics = [#tpu.dimension_semantics<parallel>], iteration_bounds = array<i64: 1>, scalar_prefetch = 0 : i64, scratch_operands = 0 : i64, tpu.core_type = #tpu.core_type<tc>, window_params = [{transform_indices = @transform_0, window_bounds = array<i64: 1, 128>}, {transform_indices = @transform_1, window_bounds = array<i64: 1, 128>}]} {
    %c0 = arith.constant 0 : index
    %c0_0 = arith.constant 0 : index
    %0 = vector.load %arg1[%c0, %c0_0] : memref<1x128xi32, #tpu.memory_space<vmem>>, vector<1x128xi32>
    %c-1_i32 = arith.constant -1 : i32
    %1 = vector.broadcast %c-1_i32 : i32 to vector<1x128xi32>
    %c0_i32 = arith.constant 0 : i32
    %2 = vector.broadcast %c0_i32 : i32 to vector<1x128xi32>
    %3 = arith.cmpi eq, %0, %2 : vector<1x128xi32>
    %c0_i32_1 = arith.constant 0 : i32
    %4 = vector.broadcast %c0_i32_1 : i32 to vector<1x128xi32>
    %5 = arith.select %3, %4, %1 : vector<1x128xi1>, vector<1x128xi32>
    %c15_i32 = arith.constant 15 : i32
    %6 = vector.broadcast %c15_i32 : i32 to vector<1x128xi32>
    %7 = arith.cmpi eq, %0, %6 : vector<1x128xi32>
    %c1_i32 = arith.constant 1 : i32
    %8 = vector.broadcast %c1_i32 : i32 to vector<1x128xi32>
    %9 = arith.select %7, %8, %5 : vector<1x128xi1>, vector<1x128xi32>
    %c2_i32 = arith.constant 2 : i32
    %10 = vector.broadcast %c2_i32 : i32 to vector<1x128xi32>
    %11 = arith.cmpi eq, %0, %10 : vector<1x128xi32>
    %c2_i32_2 = arith.constant 2 : i32
    %12 = vector.broadcast %c2_i32_2 : i32 to vector<1x128xi32>
    %13 = arith.select %11, %12, %9 : vector<1x128xi1>, vector<1x128xi32>
    %c14_i32 = arith.constant 14 : i32
    %14 = vector.broadcast %c14_i32 : i32 to vector<1x128xi32>
    %15 = arith.cmpi eq, %0, %14 : vector<1x128xi32>
    %c3_i32 = arith.constant 3 : i32
    %16 = vector.broadcast %c3_i32 : i32 to vector<1x128xi32>
    %17 = arith.select %15, %16, %13 : vector<1x128xi1>, vector<1x128xi32>
    %c6_i32 = arith.constant 6 : i32
    %18 = vector.broadcast %c6_i32 : i32 to vector<1x128xi32>
    %19 = arith.cmpi eq, %0, %18 : vector<1x128xi32>
    %c4_i32 = arith.constant 4 : i32
    %20 = vector.broadcast %c4_i32 : i32 to vector<1x128xi32>
    %21 = arith.select %19, %20, %17 : vector<1x128xi1>, vector<1x128xi32>
    %c7_i32 = arith.constant 7 : i32
    %22 = vector.broadcast %c7_i32 : i32 to vector<1x128xi32>
    %23 = arith.cmpi eq, %0, %22 : vector<1x128xi32>
    %c5_i32 = arith.constant 5 : i32
    %24 = vector.broadcast %c5_i32 : i32 to vector<1x128xi32>
    %25 = arith.select %23, %24, %21 : vector<1x128xi1>, vector<1x128xi32>
    %c0_3 = arith.constant 0 : index
    %c0_4 = arith.constant 0 : index
    %26 = vector.load %arg2[%c0_3, %c0_4] : memref<1x128xi32, #tpu.memory_space<vmem>>, vector<1x128xi32>
    tpu.vector_store %arg2[%c0_3, %c0_4], %25 {strides = array<i32>} : memref<1x128xi32, #tpu.memory_space<vmem>>, vector<1x128xi32>,
    return
  }
  func.func @transform_0(%arg0: i32) -> (i32, i32) {
    %c0_i32 = arith.constant 0 : i32
    %c0_i32_0 = arith.constant 0 : i32
    return %arg0, %c0_i32 : i32, i32
  }
  func.func @transform_1(%arg0: i32) -> (i32, i32) {
    %c0_i32 = arith.constant 0 : i32
    %c0_i32_0 = arith.constant 0 : i32
    return %arg0, %c0_i32 : i32, i32
  }
}

</mosaic_0001>

<bundles_post_ra>
// kernel: filter_categories.1
= control target key start
LH: loop header
LB: loop body
LE: loop exit
PB: predicated region body
PF: predicated region fallthrough
CT: control target
= control target key end

     0   :  { %v27_v1 = vmov 4294967295   ;;  %s44_s0 = inlined_call_operand.vmem [shape: s32[1,128], index: 0, kind: input, shape index: {}]   ;;  %s45_s1 = inlined_call_operand.vmem [shape: s32[1,128], index: 1, kind: output, shape index: {}]  }
   0x1   :  { %v8_v0 = vld [vmem:[%s44_s0] sm:$0x1] }
   0x2   :  { %vm9_vm0 = vcmp.eq.s32.totalorder %v8_v0, 0  ;;  %vm11_vm1 = vcmp.eq.s32.totalorder %v8_v0, 15  ;;  %vm13_vm2 = vcmp.eq.s32.totalorder %v8_v0, 2  ;;  %vm15_vm3 = vcmp.eq.s32.totalorder %v8_v0, 14 }
   0x3   :  { %v10_v2 = vsel %vm9_vm0, 0, %v27_v1  ;;  %vm17_vm4 = vcmp.eq.s32.totalorder %v8_v0, 6  ;;  %vm19_vm5 = vcmp.eq.s32.totalorder %v8_v0, 7 }
   0x4   :  { %v12_v3 = vsel %vm11_vm1, 1, %v10_v2 }
   0x5   :  { %v14_v4 = vsel %vm13_vm2, 2, %v12_v3 }
   0x6   :  { %v16_v5 = vsel %vm15_vm3, 3, %v14_v4 }
   0x7   :  { %v18_v6 = vsel %vm17_vm4, 4, %v16_v5 }
   0x8   :  { %v20_v7 = vsel %vm19_vm5, 5, %v18_v6 }
   0x9   :  { %21 = vst [vmem:[%s45_s1] sm:$0x1] %v20_v7 }

</bundles_post_ra>
